<compile_context>
chip_gen: v7x
topology: tpu7x:2x2x1
jax: 0.10.0
libtpu: 0.0.40
codegen_flags: <defaults>
</compile_context>

<pallas_src>
import functools

import jax
import jax.numpy as jnp
import numpy as np
from jax.experimental import pallas as pl
from jax.experimental.pallas import tpu as pltpu

EPS = 1e-07


def _f1_loss_kernel(logits_ref, tgt_ref, part_ref, acc_ref, *,
                    total_rows, tiles_per_split, row_tile, eps):
    s = pl.program_id(0)   # core split (parallel axis -> megacore on v7x)
    j = pl.program_id(1)   # row-tile index within this split (arbitrary axis)

    @pl.when(j == 0)
    def _():
        acc_ref[...] = jnp.zeros_like(acc_ref)

    probas = jax.nn.sigmoid(logits_ref[...].astype(jnp.float32))   # (TB, C)
    target = tgt_ref[...].astype(jnp.float32)                      # (TB, C)

    # Per-row (dim=1) reductions. These lane-direction sums run on the XLU; at
    # the chosen tile sizes they hide under the HBM DMA / EUP sigmoid. (An MXU
    # ones-matmul row-sum is a possible follow-up if profiling ever shows the
    # XLU as the binding slot.)
    tp = jnp.sum(probas * target, axis=1, keepdims=True)           # (TB, 1)
    sum_p = jnp.sum(probas, axis=1, keepdims=True)                 # (TB, 1)
    sum_t = jnp.sum(target, axis=1, keepdims=True)                 # (TB, 1)

    precision = tp / (sum_p + eps)
    recall = tp / (sum_t + eps)
    f1 = 2.0 * precision * recall / (precision + recall + eps)
    f1 = jnp.clip(f1, eps, 1.0 - eps)                              # (TB, 1)

    # Mask rows past the true batch size (ragged tail / padded split tiles).
    row_start = (s * tiles_per_split + j) * row_tile
    row_ids = row_start + jax.lax.broadcasted_iota(jnp.int32, (row_tile, 1), 0)
    f1 = jnp.where(row_ids < total_rows, f1, 0.0)

    # Vector accumulator: one cheap VALU add per step, no per-step XLU reduce.
    acc_ref[...] += f1

    @pl.when(j == tiles_per_split - 1)
    def _():
        split_sum = jnp.sum(acc_ref[...], keepdims=True)           # (1, 1)
        part_ref[...] = jnp.broadcast_to(split_sum, part_ref.shape)


def _pick_row_tile(n_rows, n_cols, combined_itemsize,
                   vmem_input_budget=16 * 1024 * 1024, max_rows=1024):
    """Largest multiple-of-8 row tile whose double-buffered inputs fit the budget."""
    per_row = 2 * n_cols * combined_itemsize       # 2 pipeline buffers per input
    tile = vmem_input_budget // max(per_row, 1)
    tile = max(8, min(max_rows, tile))
    tile = (tile // 8) * 8
    padded_rows = ((n_rows + 7) // 8) * 8
    return max(8, min(tile, padded_rows))


def f1_loss(output, target, *, epsilon=EPS, row_tile=None, num_splits=2):
    """Pallas equivalent of F1_Loss().forward(output, target) for (N, C) inputs."""
    assert output.shape == target.shape and output.ndim == 2
    n, c = output.shape
    combined_itemsize = (jnp.dtype(output.dtype).itemsize
                         + jnp.dtype(target.dtype).itemsize)

    if row_tile is None:
        row_tile = _pick_row_tile(n, c, combined_itemsize)
    assert row_tile > 0 and row_tile % 8 == 0

    total_tiles = pl.cdiv(n, row_tile)
    num_splits = int(max(1, min(num_splits, total_tiles)))
    tiles_per_split = pl.cdiv(total_tiles, num_splits)

    def in_map(s, j):
        # Clamp so no grid step requests a fully out-of-bounds block DMA
        # (those padded steps are zero-masked inside the kernel anyway).
        return (jnp.minimum(s * tiles_per_split + j, total_tiles - 1), 0)

    kernel = functools.partial(
        _f1_loss_kernel,
        total_rows=n,
        tiles_per_split=tiles_per_split,
        row_tile=row_tile,
        eps=float(epsilon),
    )

    # Explicit VMEM limit: double-buffered inputs + scratch + headroom, so large
    # tiles keep 2-deep pipelining on v5e (16 MiB scoped default) and stay well
    # under v7x's 64 MiB physical VMEM.
    input_bytes = 2 * row_tile * c * combined_itemsize
    vmem_limit = int(min(max(input_bytes + (8 << 20), 16 << 20), 48 << 20))

    partials = pl.pallas_call(
        kernel,
        out_shape=jax.ShapeDtypeStruct((8, num_splits * 128), jnp.float32),
        grid_spec=pltpu.PrefetchScalarGridSpec(
            num_scalar_prefetch=0,
            grid=(num_splits, tiles_per_split),
            in_specs=[
                pl.BlockSpec((row_tile, c), in_map),
                pl.BlockSpec((row_tile, c), in_map),
            ],
            out_specs=pl.BlockSpec((8, 128), lambda s, j: (0, s)),
            scratch_shapes=[pltpu.VMEM((row_tile, 1), jnp.float32)],
        ),
        compiler_params=pltpu.CompilerParams(
            dimension_semantics=("parallel", "arbitrary"),
            vmem_limit_bytes=vmem_limit,
        ),
    )(output, target)

    # Each split's (8,128) tile is filled with its partial sum of per-row f1.
    split_sums = partials[0, ::128]                   # (num_splits,)
    return 1.0 - jnp.sum(split_sums) / n


def f1_loss_ref(output, target, epsilon=EPS):
    probas = jax.nn.sigmoid(output.astype(jnp.float32))
    tgt = target.astype(jnp.float32)
    tp = (probas * tgt).sum(axis=1)
    precision = tp / (probas.sum(axis=1) + epsilon)
    recall = tp / (tgt.sum(axis=1) + epsilon)
    f1 = 2.0 * precision * recall / (precision + recall + epsilon)
    f1 = jnp.clip(f1, epsilon, 1.0 - epsilon)
    return 1.0 - f1.mean()


if __name__ == "__main__":
    key = jax.random.PRNGKey(0)
    k1, k2, k3, k4 = jax.random.split(key, 4)

    # Test 1: small aligned shapes (single tile, single split).
    N1, C1 = 16, 128
    out1 = jax.random.normal(k1, (N1, C1), dtype=jnp.float32)
    tgt1 = (jax.random.uniform(k2, (N1, C1)) > 0.5).astype(jnp.float32)
    loss1 = jax.block_until_ready(f1_loss(out1, tgt1))
    ref1 = jax.block_until_ready(f1_loss_ref(out1, tgt1))
    np.testing.assert_allclose(np.asarray(loss1), np.asarray(ref1),
                               rtol=1e-5, atol=1e-6)

    # Test 2: ragged N (not a multiple of the row tile) + multi-step grid with a
    # 2-way split, exercising the tail-row masking and per-split partial sums.
    N2, C2 = 37, 96
    out2 = jax.random.normal(k3, (N2, C2), dtype=jnp.float32)
    tgt2 = (jax.random.uniform(k4, (N2, C2)) > 0.5).astype(jnp.float32)
    loss2 = jax.block_until_ready(f1_loss(out2, tgt2, row_tile=8))
    ref2 = jax.block_until_ready(f1_loss_ref(out2, tgt2))
    np.testing.assert_allclose(np.asarray(loss2), np.asarray(ref2),
                               rtol=1e-5, atol=1e-6)

    print("KERNEL_OK")
</pallas_src>

<mosaic_0001>
module attributes {stable_mosaic.version = 11 : i64} {
  func.func @_f1_loss_kernel(%arg0: i32, %arg1: i32, %arg2: memref<16x128xf32, #tpu.memory_space<vmem>>, %arg3: memref<16x128xf32, #tpu.memory_space<vmem>>, %arg4: memref<8x128xf32, #tpu.memory_space<vmem>>, %arg5: memref<16x1xf32, #tpu.memory_space<vmem>>) attributes {dimension_semantics = [#tpu.dimension_semantics<parallel>, #tpu.dimension_semantics<arbitrary>], iteration_bounds = array<i64: 1, 1>, scalar_prefetch = 0 : i64, scratch_operands = 1 : i64, tpu.core_type = #tpu.core_type<tc>, window_params = [{transform_indices = @transform_0, window_bounds = array<i64: 16, 128>}, {transform_indices = @transform_1, window_bounds = array<i64: 16, 128>}, {transform_indices = @transform_2, window_bounds = array<i64: 8, 128>}]} {
    %c0_i32 = arith.constant 0 : i32
    %0 = arith.cmpi eq, %arg1, %c0_i32 : i32
    %1 = arith.extui %0 : i1 to i32
    %c0_i32_0 = arith.constant 0 : i32
    %2 = arith.cmpi ne, %1, %c0_i32_0 : i32
    scf.if %2 {
      %cst_21 = arith.constant 0.000000e+00 : f32
      %50 = vector.broadcast %cst_21 : f32 to vector<16x1xf32>
      %c0_22 = arith.constant 0 : index
      %c0_23 = arith.constant 0 : index
      %51 = vector.load %arg5[%c0_22, %c0_23] : memref<16x1xf32, #tpu.memory_space<vmem>>, vector<16x1xf32>
      tpu.vector_store %arg5[%c0_22, %c0_23], %50 {strides = array<i32>} : memref<16x1xf32, #tpu.memory_space<vmem>>, vector<16x1xf32>,
    } else {
    }
    %c0 = arith.constant 0 : index
    %c0_1 = arith.constant 0 : index
    %3 = vector.load %arg2[%c0, %c0_1] : memref<16x128xf32, #tpu.memory_space<vmem>>, vector<16x128xf32>
    %4 = arith.negf %3 : vector<16x128xf32>
    %5 = math.exp %4 : vector<16x128xf32>
    %cst = arith.constant 1.000000e+00 : f32
    %6 = vector.broadcast %cst : f32 to vector<16x128xf32>
    %7 = arith.addf %6, %5 : vector<16x128xf32>
    %8 = arith.divf %6, %7 : vector<16x128xf32>
    %c0_2 = arith.constant 0 : index
    %c0_3 = arith.constant 0 : index
    %9 = vector.load %arg3[%c0_2, %c0_3] : memref<16x128xf32, #tpu.memory_space<vmem>>, vector<16x128xf32>
    %10 = arith.mulf %8, %9 : vector<16x128xf32>
    %cst_4 = arith.constant dense<0.000000e+00> : vector<16xf32>
    %11 = vector.multi_reduction <add>, %10, %cst_4 [1] : vector<16x128xf32> to vector<16xf32>
    %12 = vector.shape_cast %11 : vector<16xf32> to vector<16x1xf32>
    %cst_5 = arith.constant dense<0.000000e+00> : vector<16xf32>
    %13 = vector.multi_reduction <add>, %8, %cst_5 [1] : vector<16x128xf32> to vector<16xf32>
    %14 = vector.shape_cast %13 : vector<16xf32> to vector<16x1xf32>
    %cst_6 = arith.constant dense<0.000000e+00> : vector<16xf32>
    %15 = vector.multi_reduction <add>, %9, %cst_6 [1] : vector<16x128xf32> to vector<16xf32>
    %16 = vector.shape_cast %15 : vector<16xf32> to vector<16x1xf32>
    %cst_7 = arith.constant 1.000000e-07 : f32
    %17 = vector.broadcast %cst_7 : f32 to vector<16x1xf32>
    %18 = arith.addf %14, %17 : vector<16x1xf32>
    %19 = arith.divf %12, %18 : vector<16x1xf32>
    %cst_8 = arith.constant 1.000000e-07 : f32
    %20 = vector.broadcast %cst_8 : f32 to vector<16x1xf32>
    %21 = arith.addf %16, %20 : vector<16x1xf32>
    %22 = arith.divf %12, %21 : vector<16x1xf32>
    %cst_9 = arith.constant 2.000000e+00 : f32
    %23 = vector.broadcast %cst_9 : f32 to vector<16x1xf32>
    %24 = arith.mulf %23, %19 : vector<16x1xf32>
    %25 = arith.mulf %24, %22 : vector<16x1xf32>
    %26 = arith.addf %19, %22 : vector<16x1xf32>
    %cst_10 = arith.constant 1.000000e-07 : f32
    %27 = vector.broadcast %cst_10 : f32 to vector<16x1xf32>
    %28 = arith.addf %26, %27 : vector<16x1xf32>
    %29 = arith.divf %25, %28 : vector<16x1xf32>
    %cst_11 = arith.constant 1.000000e-07 : f32
    %cst_12 = arith.constant 0.99999988 : f32
    %30 = vector.broadcast %cst_11 : f32 to vector<16x1xf32>
    %31 = arith.maximumf %30, %29 : vector<16x1xf32>
    %32 = vector.broadcast %cst_12 : f32 to vector<16x1xf32>
    %33 = arith.minimumf %32, %31 : vector<16x1xf32>
    %c1_i32 = arith.constant 1 : i32
    %34 = arith.muli %arg0, %c1_i32 : i32
    %35 = arith.addi %34, %arg1 : i32
    %c16_i32 = arith.constant 16 : i32
    %36 = arith.muli %35, %c16_i32 : i32
    %37 = tpu.iota {dimensions = array<i32: 0>} : vector<16x1xi32>
    %38 = vector.broadcast %36 : i32 to vector<16x1xi32>
    %39 = arith.addi %38, %37 : vector<16x1xi32>
    %c16_i32_13 = arith.constant 16 : i32
    %40 = vector.broadcast %c16_i32_13 : i32 to vector<16x1xi32>
    %41 = arith.cmpi slt, %39, %40 : vector<16x1xi32>
    %cst_14 = arith.constant 0.000000e+00 : f32
    %42 = vector.broadcast %cst_14 : f32 to vector<16x1xf32>
    %43 = arith.select %41, %33, %42 : vector<16x1xi1>, vector<16x1xf32>
    %c0_15 = arith.constant 0 : index
    %c0_16 = arith.constant 0 : index
    %44 = vector.load %arg5[%c0_15, %c0_16] : memref<16x1xf32, #tpu.memory_space<vmem>>, vector<16x1xf32>
    %45 = arith.addf %44, %43 : vector<16x1xf32>
    %c0_17 = arith.constant 0 : index
    %c0_18 = arith.constant 0 : index
    %46 = vector.load %arg5[%c0_17, %c0_18] : memref<16x1xf32, #tpu.memory_space<vmem>>, vector<16x1xf32>
    tpu.vector_store %arg5[%c0_17, %c0_18], %45 {strides = array<i32>} : memref<16x1xf32, #tpu.memory_space<vmem>>, vector<16x1xf32>,
    %c0_i32_19 = arith.constant 0 : i32
    %47 = arith.cmpi eq, %arg1, %c0_i32_19 : i32
    %48 = arith.extui %47 : i1 to i32
    %c0_i32_20 = arith.constant 0 : i32
    %49 = arith.cmpi ne, %48, %c0_i32_20 : i32
    scf.if %49 {
      %c0_21 = arith.constant 0 : index
      %c0_22 = arith.constant 0 : index
      %50 = vector.load %arg5[%c0_21, %c0_22] : memref<16x1xf32, #tpu.memory_space<vmem>>, vector<16x1xf32>
      %51 = vector.shape_cast %50 : vector<16x1xf32> to vector<1x16x1xf32>
      %cst_23 = arith.constant dense<0.000000e+00> : vector<1xf32>
      %52 = vector.multi_reduction <add>, %51, %cst_23 [1, 2] : vector<1x16x1xf32> to vector<1xf32>
      %53 = vector.shape_cast %52 : vector<1xf32> to vector<1x1x1xf32>
      %54 = vector.extract %53[0, 0, 0] : f32 from vector<1x1x1xf32>
      %55 = vector.broadcast %54 : f32 to vector<1x1xf32>
      %56 = vector.shape_cast %55 : vector<1x1xf32> to vector<1x1xf32>
      %57 = vector.broadcast %56 : vector<1x1xf32> to vector<8x128xf32>
      %c0_24 = arith.constant 0 : index
      %c0_25 = arith.constant 0 : index
      %58 = vector.load %arg4[%c0_24, %c0_25] : memref<8x128xf32, #tpu.memory_space<vmem>>, vector<8x128xf32>
      tpu.vector_store %arg4[%c0_24, %c0_25], %57 {strides = array<i32>} : memref<8x128xf32, #tpu.memory_space<vmem>>, vector<8x128xf32>,
    } else {
    }
    return
  }
  func.func @transform_0(%arg0: i32, %arg1: i32) -> (i32, i32) {
    %c1_i32 = arith.constant 1 : i32
    %0 = arith.muli %arg0, %c1_i32 : i32
    %1 = arith.addi %0, %arg1 : i32
    %c0_i32 = arith.constant 0 : i32
    %2 = arith.minsi %1, %c0_i32 : i32
    %c0_i32_0 = arith.constant 0 : i32
    %c0_i32_1 = arith.constant 0 : i32
    return %2, %c0_i32_0 : i32, i32
  }
  func.func @transform_1(%arg0: i32, %arg1: i32) -> (i32, i32) {
    %c1_i32 = arith.constant 1 : i32
    %0 = arith.muli %arg0, %c1_i32 : i32
    %1 = arith.addi %0, %arg1 : i32
    %c0_i32 = arith.constant 0 : i32
    %2 = arith.minsi %1, %c0_i32 : i32
    %c0_i32_0 = arith.constant 0 : i32
    %c0_i32_1 = arith.constant 0 : i32
    return %2, %c0_i32_0 : i32, i32
  }
  func.func @transform_2(%arg0: i32, %arg1: i32) -> (i32, i32) {
    %c0_i32 = arith.constant 0 : i32
    %c0_i32_0 = arith.constant 0 : i32
    return %c0_i32, %arg0 : i32, i32
  }
}

</mosaic_0001>

<bundles_post_ra>
// kernel: tpu_custom_call.1
= control target key start
LH: loop header
LB: loop body
LE: loop exit
PB: predicated region body
PF: predicated region fallthrough
CT: control target
= control target key end

     0   :  { %7 = vsyncpa [#allocation4], 0  ;;  %s348_s0 = inlined_call_operand.hbm [shape: f32[16,128], index: 0, kind: input, shape index: {}]   ;;  %s349_s1 = inlined_call_operand.hbm [shape: f32[16,128], index: 1, kind: input, shape index: {}]   ;;  %s350_s2 = inlined_call_operand.hbm [shape: f32[8,128], index: 2, kind: output, shape index: {}]  }
   0x1   :  { %8 = vsyncpa [#allocation7], 0 }
   0x2   :  { %9 = vsyncpa [#allocation5], 0  ;;  %s285_s9 = smov [#allocation3]   ;;  %s213_s13 = scalar_lea.hbm %s348_s0, 256 }
   0x3   :  { %s21_s10 = sshll.u32 %s285_s9, 4  ;;  %p214_p0 = scmp.ne.s32.totalorder %s348_s0, %s213_s13  ;;  %s22_s10 = int_to_ptr.vmem [resolvable:$true] %s21_s10 }
   0x4   :  { %p217_p1 = scmp.lt.u32.totalorder %s213_s13, %s348_s0 }
   0x6   :  { %p219_p2 = pnand %p217_p1, %p214_p0 }
   0x8   :  { %222 = shalt.err (!%p219_p2)
}
   0x9   :  { %s223_s18 = scalar_lea.vmem %s22_s10, 256  ;;  %p228_p4 = scmp.lt.s32.totalorder %s22_s10, %s22_s10 }
   0xa   :  { %p224_p3 = scmp.ne.s32.totalorder %s22_s10, %s223_s18  ;;  %p229_p5 = scmp.lt.s32.totalorder %s223_s18, %s223_s18 }
   0xc   :  { %p230_p6 = por %p229_p5, %p228_p4 }
   0xe   :  { %p231_p7 = pnand %p230_p6, %p224_p3 }
  0x10   :  { %234 = shalt.err (!%p231_p7)
}
  0x11   :  { %s286_s19 = smov 128   ;;  %s287_s20 = smov 8  }
  0x12   :  { %27 = dma.hbm_to_vmem [thread:$0]  %s348_s0, 256, %s22_s10, [#allocation4], %s286_s19, %s286_s19, %s287_s20  }
  0x13   :  { %s288_s23 = smov [#allocation6]   ;;  %s235_s27 = scalar_lea.hbm %s349_s1, 256 }
  0x14   :  { %s39_s24 = sshll.u32 %s288_s23, 4  ;;  %p236_p8 = scmp.ne.s32.totalorder %s349_s1, %s235_s27  ;;  %s40_s24 = int_to_ptr.vmem [resolvable:$true] %s39_s24 }
  0x15   :  { %p239_p9 = scmp.lt.u32.totalorder %s235_s27, %s349_s1 }
  0x17   :  { %p241_p10 = pnand %p239_p9, %p236_p8 }
  0x19   :  { %244 = shalt.err (!%p241_p10)
}
  0x1a   :  { %s245_s4 = scalar_lea.vmem %s40_s24, 256  ;;  %p250_p12 = scmp.lt.s32.totalorder %s40_s24, %s40_s24 }
  0x1b   :  { %p246_p11 = scmp.ne.s32.totalorder %s40_s24, %s245_s4  ;;  %p251_p13 = scmp.lt.s32.totalorder %s245_s4, %s245_s4 }
  0x1d   :  { %p252_p0 = por %p251_p13, %p250_p12 }
  0x1f   :  { %p253_p1 = pnand %p252_p0, %p246_p11 }
  0x21   :  { %256 = shalt.err (!%p253_p1)
}
  0x22   :  { %45 = dma.hbm_to_vmem [thread:$0]  %s349_s1, 256, %s40_s24, [#allocation7], %s286_s19, %s286_s19, %s287_s20  }
  0x23   :  { %279 = dma.done.wait [#allocation4], 256  }
  0x24   :  { %280 = vsyncadd [#allocation4], 4294967040 }
  0x25   :  { %281 = dma.done.wait [#allocation7], 256  }
  0x26   :  { %282 = vsyncadd [#allocation7], 4294967040  ;;  %v81_v0 = vld [vmem:[#allocation6] sm:$0xff]  ;;  %v67_v1 = vld [vmem:[#allocation3] sm:$0xff]  ;;  %vm64_vm0 = vcmask 7168   ;;  %v289_v14 = vmov 0.0  }
  0x27   :  { %93 = vadd.xlane.f32.xlu1 %v81_v0  ;;  %v183_v2 = vmul.f32 -1.442695, %v67_v1  ;;  %v68_v3 = vld [vmem:[#allocation3 + $0x8] sm:$0xff]  ;;  %v82_v4 = vld [vmem:[#allocation6 + $0x8] sm:$0xff]  ;;  %65 = vst.msk [vmem:[#allocation2] sm:$0xff] %vm64_vm0, %v289_v14  ;;  %66 = vst.msk [vmem:[#allocation2 + $0x8] sm:$0xff] %vm64_vm0, %v289_v14 }
  0x28   :  { %v184_v5 = vmul.f32 -1.442695, %v68_v3  ;;  %s290_s1 = smov [#allocation8]  }
  0x29   :  { %193 = vpow2.f32 %v183_v2  ;;  %s169_s6 = sshll.u32 %s290_s1, 4  ;;  %s170_s6 = int_to_ptr.vmem [resolvable:$true] %s169_s6 }
  0x2a   :  { %195 = vpow2.f32 %v184_v5  ;;  %s257_s8 = scalar_lea.vmem %s170_s6, 128  ;;  %p262_p3 = scmp.lt.s32.totalorder %s170_s6, %s170_s6 }
  0x2b   :  { %95 = vadd.xlane.f32.xlu1 %v82_v4  ;;  %p258_p2 = scmp.ne.s32.totalorder %s170_s6, %s257_s8  ;;  %p263_p4 = scmp.lt.s32.totalorder %s257_s8, %s257_s8 }
  0x2d   :  { %p264_p5 = por %p263_p4, %p262_p3 }
  0x2e   :  { %v137_v45 = vld [vmem:[#allocation2] sm:$0xff]  ;;  %v138_v50 = vld [vmem:[#allocation2 + $0x8] sm:$0xff] }
  0x2f   :  { %p265_p6 = pnand %p264_p5, %p258_p2 }
  0x33   :  { %v194_v6 = vpop.eup %193 }
  0x34   :  { %v196_v7 = vpop.eup %195  ;;  %v75_v8 = vadd.f32 1.0, %v194_v6 }
  0x35   :  { %v76_v9 = vadd.f32 1.0, %v196_v7 }
  0x36   :  { %197 = vrcp.f32 %v75_v8 }
  0x37   :  { %199 = vrcp.f32 %v76_v9 }
  0x40   :  { %v198_v10 = vpop.eup %197 }
  0x41   :  { %v200_v11 = vpop.eup %199  ;;  %89 = vadd.xlane.f32.xlu0 %v198_v10  ;;  %v83_v13 = vmul.f32 %v198_v10, %v81_v0 }
  0x42   :  { %v84_v12 = vmul.f32 %v200_v11, %v82_v4 }
  0x44   :  { %87 = vadd.xlane.f32.xlu1 %v84_v12 }
  0x45   :  { %91 = vadd.xlane.f32.xlu0 %v200_v11 }
  0x49   :  { %85 = vadd.xlane.f32.xlu0 %v83_v13 }
  0xb4   :  { %v94_v15 = vpop.xlane.xlu1 %93 }
  0xb5   :  { %v103_v16 = vadd.f32 1e-07, %v94_v15 }
  0xb7   :  { %201 = vrcp.f32 %v103_v16 }
  0xb8   :  { %v96_v17 = vpop.xlane.xlu1 %95 }
  0xb9   :  { %v104_v18 = vadd.f32 1e-07, %v96_v17 }
  0xbb   :  { %203 = vrcp.f32 %v104_v18 }
  0xc1   :  { %v202_v23 = vpop.eup %201 }
  0xc5   :  { %v204_v25 = vpop.eup %203 }
  0xce   :  { %v90_v19 = vpop.xlane.xlu0 %89 }
  0xcf   :  { %v97_v20 = vadd.f32 1e-07, %v90_v19 }
  0xd1   :  { %205 = vrcp.f32 %v97_v20  ;;  %v88_v28 = vpop.xlane.xlu1 %87 }
  0xd2   :  { %v92_v21 = vpop.xlane.xlu0 %91  ;;  %v108_v31 = vmul.f32 %v204_v25, %v88_v28 }
  0xd3   :  { %v98_v22 = vadd.f32 1e-07, %v92_v21 }
  0xd5   :  { %207 = vrcp.f32 %v98_v22 }
  0xd6   :  { %v86_v24 = vpop.xlane.xlu0 %85 }
  0xd7   :  { %v106_v26 = vmul.f32 %v202_v23, %v86_v24 }
  0xdb   :  { %v206_v27 = vpop.eup %205 }
  0xdc   :  { %v100_v29 = vmul.f32 %v206_v27, %v86_v24 }
  0xde   :  { %v113_v30 = vadd.f32 %v106_v26, %v100_v29  ;;  %v109_v37 = vmul.f32 2.0, %v100_v29 }
  0xdf   :  { %v208_v32 = vpop.eup %207 }
  0xe0   :  { %v115_v33 = vadd.f32 1e-07, %v113_v30  ;;  %v102_v34 = vmul.f32 %v208_v32, %v88_v28  ;;  %v111_v38 = vmul.f32 %v109_v37, %v106_v26 }
  0xe2   :  { %209 = vrcp.f32 %v115_v33  ;;  %v114_v35 = vadd.f32 %v108_v31, %v102_v34  ;;  %v110_v39 = vmul.f32 2.0, %v102_v34 }
  0xe4   :  { %v116_v36 = vadd.f32 1e-07, %v114_v35  ;;  %v112_v43 = vmul.f32 %v110_v39, %v108_v31 }
  0xe6   :  { %211 = vrcp.f32 %v116_v36 }
  0xec   :  { %v210_v40 = vpop.eup %209 }
  0xed   :  { %v118_v41 = vmul.f32 %v210_v40, %v111_v38 }
  0xef   :  { %v121_v42 = vmax.f32 %v118_v41, 1e-07 }
  0xf0   :  { %v212_v44 = vpop.eup %211 }
  0xf1   :  { %v123_v46 = vmin.f32 %v121_v42, 0.9999999  ;;  %v120_v47 = vmul.f32 %v212_v44, %v112_v43 }
  0xf3   :  { %v139_v48 = vadd.f32 %v137_v45, %v123_v46  ;;  %v122_v49 = vmax.f32 %v120_v47, 1e-07 }
  0xf5   :  { %142 = vst.msk [vmem:[#allocation2] sm:$0xff] %vm64_vm0, %v139_v48  ;;  %v124_v51 = vmin.f32 %v122_v49, 0.9999999 }
  0xf7   :  { %v140_v52 = vadd.f32 %v138_v50, %v124_v51 }
  0xf9   :  { %143 = vst.msk [vmem:[#allocation2 + $0x8] sm:$0xff] %vm64_vm0, %v140_v52 }
  0xfc   :  { %v147_v53 = vld [vmem:[#allocation2] sm:$0xff] }
  0xfd   :  { %v149_v55 = vsel %vm64_vm0, %v147_v53, 0.0 }
 0x100   :  { %v148_v54 = vld [vmem:[#allocation2 + $0x8] sm:$0xff] }
 0x101   :  { %v150_v56 = vsel %vm64_vm0, %v148_v54, 0.0 }
 0x102   :  { %v151_v57 = vadd.f32 %v150_v56, %v149_v55 }
 0x104   :  { %152 = vadd.xlane.f32.xlu0 %v151_v57 }
 0x191   :  { %v153_v58 = vpop.xlane.xlu0 %152 }
 0x192   :  { %v154_v59 = vrot.slane %v153_v58, 4 }
 0x194   :  { %v155_v60 = vadd.f32 %v154_v59, %v153_v58 }
 0x196   :  { %v156_v61 = vrot.slane %v155_v60, 2 }
 0x198   :  { %v157_v62 = vadd.f32 %v156_v61, %v155_v60 }
 0x19a   :  { %v158_v63 = vrot.slane %v157_v62, 1 }
 0x19c   :  { %v159_v0 = vadd.f32 %v158_v63, %v157_v62 }
 0x19e   :  { %185 = vpush %v159_v0 }
 0x1cf   :  { %s186_s7 = spop %185 }
 0x1d0   :  { %v161_v1 = vstv %s186_s7 }
 0x1d1   :  { %162 = vst [vmem:[#allocation8] sm:$0xff] %v161_v1 }
 0x1d2   :  { %268 = shalt.err (!%p265_p6)
}
 0x1d3   :  { %s269_s11 = scalar_lea.hbm %s350_s2, 128 }
 0x1d4   :  { %p270_p7 = scmp.ne.s32.totalorder %s350_s2, %s269_s11  ;;  %p273_p8 = scmp.lt.u32.totalorder %s269_s11, %s350_s2 }
 0x1d6   :  { %p275_p9 = pnand %p273_p8, %p270_p7 }
 0x1d8   :  { %278 = shalt.err (!%p275_p9)
}
 0x1d9   :  { %172 = dma.vmem_to_hbm [thread:$0]  %s170_s6, 128, %s350_s2, [#allocation5]  }
 0x1da   :  { %283 = dma.done.wait [#allocation5], 128  }
 0x1db   :  { %284 = vsyncadd [#allocation5], 4294967168 }
 0x1dc   :  { %176 = vsyncpa [#allocation4], 1 }
 0x1dd   :  { %177 = vsyncpa [#allocation7], 1 }
 0x1de   :  { %178 = vsyncpa [#allocation5], 1 }

</bundles_post_ra>
